<compile_context>
chip_gen: v7x
topology: tpu7x:2x2x1
jax: 0.10.0
libtpu: 0.0.40
codegen_flags: <defaults>
</compile_context>

<pallas_src>
import functools

import jax
import jax.numpy as jnp
from jax.experimental import pallas as pl
from jax.experimental.pallas import tpu as pltpu


def _round_up(v, m):
    return ((v + m - 1) // m) * m


def _cdiv(a, b):
    return -(-a // b)


def _conv1d_im2col_kernel(x_ref, w_ref, o_ref, slab_ref, acc_ref, *,
                          kernel_size, c_in_p, tb, l_out_p, l_x_p):
    # x_ref:    (TB, C_in_p, L_x_p)            one batch tile (zero-padded)
    # w_ref:    (C_out_p, K*C_in_p + 8)        flattened weight + bias column
    # o_ref:    (TB, C_out_p, L_out_p)         lane-dense output tile
    # slab_ref: (K*C_in_p + 8, TB*L_out_p)     im2col scratch slab (VMEM)
    # acc_ref:  (C_out_p, TB*L_out_p)          f32 accumulator scratch (VMEM)
    kc = kernel_size * c_in_p
    n_lanes = tb * l_out_p

    # Bias rows of the slab: row 0 of the 8-row pad block is ones (matching
    # the bias column of w_ref); the remaining rows are zeroed every step so
    # uninitialized VMEM can never inject NaNs into the f32 accumulation.
    # (Written unconditionally: with a megacore-split grid each core owns its
    # own scratch, so a program_id==0 guard would be wrong.)
    row = jax.lax.broadcasted_iota(jnp.int32, (8, n_lanes), 0)
    slab_ref[pl.ds(kc, 8), :] = jnp.where(row == 0, 1.0, 0.0).astype(slab_ref.dtype)

    for b in range(tb):
        xb = x_ref[b]  # (C_in_p, L_x_p): loaded once, shifted K times
        for kk in range(kernel_size):
            # Lane shift through the XLU (roll), then an aligned [:, :L_out_p]
            # slice; written directly into the scratch slab (no concatenate).
            shifted = xb if kk == 0 else pltpu.roll(xb, shift=l_x_p - kk, axis=1)
            slab_ref[pl.ds(kk * c_in_p, c_in_p), pl.ds(b * l_out_p, l_out_p)] = (
                shifted[:, :l_out_p])

    # One MXU matmul per grid step; bias accumulated for free via the ones row.
    acc_ref[...] = jnp.dot(w_ref[...], slab_ref[...],
                           preferred_element_type=jnp.float32)
    for b in range(tb):
        o_ref[b] = acc_ref[:, b * l_out_p:(b + 1) * l_out_p].astype(o_ref.dtype)


def lora_conv1d_forward(x, weight, bias):
    """Forward of LoRAConv1d: the base Conv1d (stride 1, no padding)."""
    n, c_in, length = x.shape
    c_out, c_in_w, k = weight.shape
    assert c_in == c_in_w
    if length < k:
        raise ValueError(f"length ({length}) must be >= kernel_size ({k})")
    if bias is None:
        bias = jnp.zeros((c_out,), dtype=x.dtype)
    l_out = length - k + 1

    # Padded / tiled sizes.
    c_in_p = _round_up(c_in, 8)
    c_out_p = _round_up(c_out, 8)
    l_out_p = _round_up(l_out, 128)                          # lane-dense output
    l_x_p = _round_up(max(length, l_out_p + k - 1), 128)     # lane-dense input
    kc = k * c_in_p
    kc8 = kc + 8                                             # +8 rows: folded bias

    itemsize = jnp.dtype(x.dtype).itemsize
    w_bytes = c_out_p * kc8 * itemsize                       # single-buffered

    def _block_bytes(tb_):
        x_blk = tb_ * c_in_p * l_x_p * itemsize
        o_blk = tb_ * c_out_p * l_out_p * itemsize
        slab = kc8 * tb_ * l_out_p * itemsize                # scratch (1 copy)
        acc = c_out_p * tb_ * l_out_p * 4                    # f32 scratch
        return 2 * (x_blk + o_blk) + slab + acc              # x/o double-buffered

    # Generation-aware VMEM budget: ~half of physical capacity (32 MiB on a
    # 64 MiB v7x part), capped at 48 MiB on 128 MiB v5e/v6e parts.
    vmem_cap = 64 << 20
    try:
        vmem_cap = int(pltpu.get_tpu_info().vmem_capacity_bytes)
    except Exception:
        pass
    budget = min(48 << 20, vmem_cap // 2)

    tb_cap = max(1, int((budget - w_bytes) // max(_block_bytes(1), 1)))
    if n <= 1:
        tb = 1
    else:
        # Big batch tiles (few grid steps, big MXU N dim) but keep >= 2 steps
        # so v7x's two TensorCores both get work; the extra step costs only
        # ~0.35us on single-core v5e/v6e.
        tb = max(1, min(tb_cap, _cdiv(n, 2)))
    n_p = _round_up(n, tb)
    # Prefer an even number of grid steps when VMEM forces many steps, so the
    # "parallel" axis splits evenly across two TensorCores.
    if n_p // tb > 2 and (n_p // tb) % 2 == 1:
        for cand in range(tb, 0, -1):
            if _cdiv(n, cand) % 2 == 0:
                tb = cand
                break
        n_p = _round_up(n, tb)
    grid = n_p // tb

    vmem_limit = int(min(int(0.9 * vmem_cap),
                         max(budget, w_bytes + 2 * _block_bytes(tb))))

    # One-time layout work (padding, weight flatten, bias fold). Skipped when
    # already aligned; allow_input_fusion lets XLA fuse the pads into the call.
    pads = ((0, n_p - n), (0, c_in_p - c_in), (0, l_x_p - length))
    x_p = jnp.pad(x, pads) if any(p[1] for p in pads) else x
    w_pad = jnp.pad(weight, ((0, c_out_p - c_out), (0, c_in_p - c_in), (0, 0)))
    w_flat = jnp.transpose(w_pad, (0, 2, 1)).reshape(c_out_p, kc)   # [k][c] order
    b_cols = jnp.zeros((c_out_p, 8), w_flat.dtype).at[:c_out, 0].set(
        bias.astype(w_flat.dtype))
    w_full = jnp.concatenate([w_flat, b_cols], axis=1)              # (C_out_p, kc+8)

    kernel = functools.partial(
        _conv1d_im2col_kernel, kernel_size=k, c_in_p=c_in_p, tb=tb,
        l_out_p=l_out_p, l_x_p=l_x_p)

    def _call(w_pipeline_mode):
        if w_pipeline_mode is None:
            w_spec = pl.BlockSpec((c_out_p, kc8), lambda i: (0, 0))
        else:
            w_spec = pl.BlockSpec((c_out_p, kc8), lambda i: (0, 0),
                                  pipeline_mode=w_pipeline_mode)
        return pl.pallas_call(
            kernel,
            out_shape=jax.ShapeDtypeStruct((n_p, c_out_p, l_out_p), x.dtype),
            grid_spec=pltpu.PrefetchScalarGridSpec(
                num_scalar_prefetch=0,
                grid=(grid,),
                in_specs=[
                    pl.BlockSpec((tb, c_in_p, l_x_p), lambda i: (i, 0, 0)),
                    w_spec,
                ],
                out_specs=pl.BlockSpec((tb, c_out_p, l_out_p),
                                       lambda i: (i, 0, 0)),
                scratch_shapes=[
                    pltpu.VMEM((kc8, tb * l_out_p), x.dtype),       # im2col slab
                    pltpu.VMEM((c_out_p, tb * l_out_p), jnp.float32),  # f32 acc
                ],
            ),
            compiler_params=pltpu.CompilerParams(
                dimension_semantics=("parallel",),
                vmem_limit_bytes=vmem_limit,
                allow_input_fusion=[True, True],
            ),
        )(x_p, w_full)

    try:
        # Grid-invariant weight block: single-buffer it (halves its footprint).
        out_p = _call(pl.Buffered(1))
    except Exception:
        # Fallback if this JAX build rejects pipeline_mode on pallas_call specs.
        out_p = _call(None)

    # Strip padding (batch rows, output channels, output length) if any.
    if (n_p, c_out_p, l_out_p) == (n, c_out, l_out):
        return out_p
    return out_p[:n, :c_out, :l_out]


if __name__ == "__main__":
    # Small shapes consistent with a Conv1d on 1-D biosignal data.
    batch, c_in, c_out, length, ksize, rank = 2, 4, 8, 16, 3, 2

    key = jax.random.PRNGKey(0)
    k_x, k_w, k_b, k_a = jax.random.split(key, 4)

    x = jax.random.normal(k_x, (batch, c_in, length), dtype=jnp.float32)

    # Deterministic base-conv parameters (stand-in for nn.Conv1d's weights).
    conv_weight = jax.random.normal(k_w, (c_out, c_in, ksize), dtype=jnp.float32) * 0.1
    conv_bias = jax.random.normal(k_b, (c_out,), dtype=jnp.float32) * 0.1

    # LoRA parameters from __init__ (A ~ N(0, 0.01), B = 0). Not used in
    # forward() — only by get_delta() — but kept for module fidelity.
    lora_A = jax.random.normal(k_a, (c_out, rank), dtype=jnp.float32) * 0.01
    lora_B = jnp.zeros((rank, c_in * ksize), dtype=jnp.float32)

    out = lora_conv1d_forward(x, conv_weight, conv_bias)
    out = jax.block_until_ready(out)

    # Reference: jax.lax conv (NCW / OIW), stride 1, VALID padding — matches
    # torch.nn.Conv1d defaults.
    ref = jax.lax.conv_general_dilated(
        x, conv_weight,
        window_strides=(1,), padding="VALID",
        dimension_numbers=("NCH", "OIH", "NCH"),
    ) + conv_bias.reshape(1, c_out, 1)
    assert out.shape == (batch, c_out, length - ksize + 1)
    assert jnp.allclose(out, ref, atol=1e-5, rtol=1e-5)

    print("KERNEL_OK")
</pallas_src>

<mosaic_0001>
module attributes {stable_mosaic.version = 11 : i64} {
  func.func @_conv1d_im2col_kernel(%arg0: i32, %arg1: memref<1x8x256xf32, #tpu.memory_space<vmem>>, %arg2: memref<8x32xf32, #tpu.memory_space<vmem>>, %arg3: memref<1x8x128xf32, #tpu.memory_space<vmem>>, %arg4: memref<32x128xf32, #tpu.memory_space<vmem>>, %arg5: memref<8x128xf32, #tpu.memory_space<vmem>>) attributes {dimension_semantics = [#tpu.dimension_semantics<parallel>], iteration_bounds = array<i64: 2>, scalar_prefetch = 0 : i64, scratch_operands = 2 : i64, tpu.core_type = #tpu.core_type<tc>, window_params = [{transform_indices = @transform_0, window_bounds = array<i64: 1, 8, 256>}, {pipeline_mode = #tpu.pipeline_mode<synchronous>, transform_indices = @transform_1, window_bounds = array<i64: 8, 32>}, {transform_indices = @transform_2, window_bounds = array<i64: 1, 8, 128>}]} {
    %0 = tpu.iota {dimensions = array<i32: 0>} : vector<8x128xi32>
    %c0_i32 = arith.constant 0 : i32
    %1 = vector.broadcast %c0_i32 : i32 to vector<8x128xi32>
    %2 = arith.cmpi eq, %0, %1 : vector<8x128xi32>
    %cst = arith.constant 1.000000e+00 : f32
    %cst_0 = arith.constant 0.000000e+00 : f32
    %3 = vector.broadcast %cst : f32 to vector<8x128xf32>
    %4 = vector.broadcast %cst_0 : f32 to vector<8x128xf32>
    %5 = arith.select %2, %3, %4 : vector<8x128xi1>, vector<8x128xf32>
    %c24 = arith.constant 24 : index
    %c0 = arith.constant 0 : index
    %6 = vector.load %arg4[%c24, %c0] : memref<32x128xf32, #tpu.memory_space<vmem>>, vector<8x128xf32>
    tpu.vector_store %arg4[%c24, %c0], %5 {strides = array<i32>} : memref<32x128xf32, #tpu.memory_space<vmem>>, vector<8x128xf32>,
    %c0_1 = arith.constant 0 : index
    %c0_2 = arith.constant 0 : index
    %c0_3 = arith.constant 0 : index
    %7 = vector.load %arg1[%c0_1, %c0_2, %c0_3] : memref<1x8x256xf32, #tpu.memory_space<vmem>>, vector<1x8x256xf32>
    %8 = vector.shape_cast %7 : vector<1x8x256xf32> to vector<8x256xf32>
    %9 = vector.extract_strided_slice %8 {offsets = [0, 0], sizes = [8, 128], strides = [1, 1]} : vector<8x256xf32> to vector<8x128xf32>
    %c0_4 = arith.constant 0 : index
    %c0_5 = arith.constant 0 : index
    %10 = vector.load %arg4[%c0_4, %c0_5] : memref<32x128xf32, #tpu.memory_space<vmem>>, vector<8x128xf32>
    tpu.vector_store %arg4[%c0_4, %c0_5], %9 {strides = array<i32>} : memref<32x128xf32, #tpu.memory_space<vmem>>, vector<8x128xf32>,
    %c255_i32 = arith.constant 255 : i32
    %11 = tpu.dynamic_rotate %8 by %c255_i32 dim 1 : vector<8x256xf32>, i32 -> vector<8x256xf32>
    %12 = vector.extract_strided_slice %11 {offsets = [0, 0], sizes = [8, 128], strides = [1, 1]} : vector<8x256xf32> to vector<8x128xf32>
    %c8 = arith.constant 8 : index
    %c0_6 = arith.constant 0 : index
    %13 = vector.load %arg4[%c8, %c0_6] : memref<32x128xf32, #tpu.memory_space<vmem>>, vector<8x128xf32>
    tpu.vector_store %arg4[%c8, %c0_6], %12 {strides = array<i32>} : memref<32x128xf32, #tpu.memory_space<vmem>>, vector<8x128xf32>,
    %c254_i32 = arith.constant 254 : i32
    %14 = tpu.dynamic_rotate %8 by %c254_i32 dim 1 : vector<8x256xf32>, i32 -> vector<8x256xf32>
    %15 = vector.extract_strided_slice %14 {offsets = [0, 0], sizes = [8, 128], strides = [1, 1]} : vector<8x256xf32> to vector<8x128xf32>
    %c16 = arith.constant 16 : index
    %c0_7 = arith.constant 0 : index
    %16 = vector.load %arg4[%c16, %c0_7] : memref<32x128xf32, #tpu.memory_space<vmem>>, vector<8x128xf32>
    tpu.vector_store %arg4[%c16, %c0_7], %15 {strides = array<i32>} : memref<32x128xf32, #tpu.memory_space<vmem>>, vector<8x128xf32>,
    %c0_8 = arith.constant 0 : index
    %c0_9 = arith.constant 0 : index
    %17 = vector.load %arg2[%c0_8, %c0_9] : memref<8x32xf32, #tpu.memory_space<vmem>>, vector<8x32xf32>
    %c0_10 = arith.constant 0 : index
    %c0_11 = arith.constant 0 : index
    %18 = vector.load %arg4[%c0_10, %c0_11] : memref<32x128xf32, #tpu.memory_space<vmem>>, vector<32x128xf32>
    %cst_12 = arith.constant dense<0.000000e+00> : vector<8x128xf32>
    %19 = tpu.matmul %17, %18, %cst_12 {dimension_numbers = #tpu.dot_dimension_numbers<[1], [0], [0], [1], [0, 0, 1, 1], [], []>} : vector<8x32xf32>, vector<32x128xf32>, vector<8x128xf32> -> vector<8x128xf32>
    %c0_13 = arith.constant 0 : index
    %c0_14 = arith.constant 0 : index
    %20 = vector.load %arg5[%c0_13, %c0_14] : memref<8x128xf32, #tpu.memory_space<vmem>>, vector<8x128xf32>
    tpu.vector_store %arg5[%c0_13, %c0_14], %19 {strides = array<i32>} : memref<8x128xf32, #tpu.memory_space<vmem>>, vector<8x128xf32>,
    %c0_15 = arith.constant 0 : index
    %c0_16 = arith.constant 0 : index
    %21 = vector.load %arg5[%c0_15, %c0_16] : memref<8x128xf32, #tpu.memory_space<vmem>>, vector<8x128xf32>
    %c0_17 = arith.constant 0 : index
    %c0_18 = arith.constant 0 : index
    %c0_19 = arith.constant 0 : index
    %22 = vector.load %arg3[%c0_17, %c0_18, %c0_19] : memref<1x8x128xf32, #tpu.memory_space<vmem>>, vector<1x8x128xf32>
    %23 = vector.shape_cast %22 : vector<1x8x128xf32> to vector<8x128xf32>
    %24 = vector.shape_cast %21 : vector<8x128xf32> to vector<1x8x128xf32>
    tpu.vector_store %arg3[%c0_17, %c0_18, %c0_19], %24 {strides = array<i32>} : memref<1x8x128xf32, #tpu.memory_space<vmem>>, vector<1x8x128xf32>,
    return
  }
  func.func @transform_0(%arg0: i32) -> (i32, i32, i32) {
    %c0_i32 = arith.constant 0 : i32
    %c0_i32_0 = arith.constant 0 : i32
    %c0_i32_1 = arith.constant 0 : i32
    return %arg0, %c0_i32, %c0_i32_0 : i32, i32, i32
  }
  func.func @transform_1(%arg0: i32) -> (i32, i32) {
    %c0_i32 = arith.constant 0 : i32
    %c0_i32_0 = arith.constant 0 : i32
    %c0_i32_1 = arith.constant 0 : i32
    return %c0_i32, %c0_i32_0 : i32, i32
  }
  func.func @transform_2(%arg0: i32) -> (i32, i32, i32) {
    %c0_i32 = arith.constant 0 : i32
    %c0_i32_0 = arith.constant 0 : i32
    %c0_i32_1 = arith.constant 0 : i32
    return %arg0, %c0_i32, %c0_i32_0 : i32, i32, i32
  }
}

module attributes {stable_mosaic.version = 11 : i64} {
  func.func @_conv1d_im2col_kernel(%arg0: i32, %arg1: memref<1x8x256xf32, #tpu.memory_space<vmem>>, %arg2: memref<8x32xf32, #tpu.memory_space<vmem>>, %arg3: memref<1x8x128xf32, #tpu.memory_space<vmem>>, %arg4: memref<32x128xf32, #tpu.memory_space<vmem>>, %arg5: memref<8x128xf32, #tpu.memory_space<vmem>>) attributes {dimension_semantics = [#tpu.dimension_semantics<parallel>], iteration_bounds = array<i64: 2>, scalar_prefetch = 0 : i64, scratch_operands = 2 : i64, tpu.core_type = #tpu.core_type<tc>, window_params = [{transform_indices = @transform_0, window_bounds = array<i64: 1, 8, 256>}, {pipeline_mode = #tpu.pipeline_mode<synchronous>, transform_indices = @transform_1, window_bounds = array<i64: 8, 32>}, {transform_indices = @transform_2, window_bounds = array<i64: 1, 8, 128>}]} {
    %0 = tpu.iota {dimensions = array<i32: 0>} : vector<8x128xi32>
    %c0_i32 = arith.constant 0 : i32
    %1 = vector.broadcast %c0_i32 : i32 to vector<8x128xi32>
    %2 = arith.cmpi eq, %0, %1 : vector<8x128xi32>
    %cst = arith.constant 1.000000e+00 : f32
    %cst_0 = arith.constant 0.000000e+00 : f32
    %3 = vector.broadcast %cst : f32 to vector<8x128xf32>
    %4 = vector.broadcast %cst_0 : f32 to vector<8x128xf32>
    %5 = arith.select %2, %3, %4 : vector<8x128xi1>, vector<8x128xf32>
    %c24 = arith.constant 24 : index
    %c0 = arith.constant 0 : index
    %6 = vector.load %arg4[%c24, %c0] : memref<32x128xf32, #tpu.memory_space<vmem>>, vector<8x128xf32>
    tpu.vector_store %arg4[%c24, %c0], %5 {strides = array<i32>} : memref<32x128xf32, #tpu.memory_space<vmem>>, vector<8x128xf32>,
    %c0_1 = arith.constant 0 : index
    %c0_2 = arith.constant 0 : index
    %c0_3 = arith.constant 0 : index
    %7 = vector.load %arg1[%c0_1, %c0_2, %c0_3] : memref<1x8x256xf32, #tpu.memory_space<vmem>>, vector<1x8x256xf32>
    %8 = vector.shape_cast %7 : vector<1x8x256xf32> to vector<8x256xf32>
    %9 = vector.extract_strided_slice %8 {offsets = [0, 0], sizes = [8, 128], strides = [1, 1]} : vector<8x256xf32> to vector<8x128xf32>
    %c0_4 = arith.constant 0 : index
    %c0_5 = arith.constant 0 : index
    %10 = vector.load %arg4[%c0_4, %c0_5] : memref<32x128xf32, #tpu.memory_space<vmem>>, vector<8x128xf32>
    tpu.vector_store %arg4[%c0_4, %c0_5], %9 {strides = array<i32>} : memref<32x128xf32, #tpu.memory_space<vmem>>, vector<8x128xf32>,
    %c255_i32 = arith.constant 255 : i32
    %11 = tpu.dynamic_rotate %8 by %c255_i32 dim 1 : vector<8x256xf32>, i32 -> vector<8x256xf32>
    %12 = vector.extract_strided_slice %11 {offsets = [0, 0], sizes = [8, 128], strides = [1, 1]} : vector<8x256xf32> to vector<8x128xf32>
    %c8 = arith.constant 8 : index
    %c0_6 = arith.constant 0 : index
    %13 = vector.load %arg4[%c8, %c0_6] : memref<32x128xf32, #tpu.memory_space<vmem>>, vector<8x128xf32>
    tpu.vector_store %arg4[%c8, %c0_6], %12 {strides = array<i32>} : memref<32x128xf32, #tpu.memory_space<vmem>>, vector<8x128xf32>,
    %c254_i32 = arith.constant 254 : i32
    %14 = tpu.dynamic_rotate %8 by %c254_i32 dim 1 : vector<8x256xf32>, i32 -> vector<8x256xf32>
    %15 = vector.extract_strided_slice %14 {offsets = [0, 0], sizes = [8, 128], strides = [1, 1]} : vector<8x256xf32> to vector<8x128xf32>
    %c16 = arith.constant 16 : index
    %c0_7 = arith.constant 0 : index
    %16 = vector.load %arg4[%c16, %c0_7] : memref<32x128xf32, #tpu.memory_space<vmem>>, vector<8x128xf32>
    tpu.vector_store %arg4[%c16, %c0_7], %15 {strides = array<i32>} : memref<32x128xf32, #tpu.memory_space<vmem>>, vector<8x128xf32>,
    %c0_8 = arith.constant 0 : index
    %c0_9 = arith.constant 0 : index
    %17 = vector.load %arg2[%c0_8, %c0_9] : memref<8x32xf32, #tpu.memory_space<vmem>>, vector<8x32xf32>
    %c0_10 = arith.constant 0 : index
    %c0_11 = arith.constant 0 : index
    %18 = vector.load %arg4[%c0_10, %c0_11] : memref<32x128xf32, #tpu.memory_space<vmem>>, vector<32x128xf32>
    %cst_12 = arith.constant dense<0.000000e+00> : vector<8x128xf32>
    %19 = tpu.matmul %17, %18, %cst_12 {dimension_numbers = #tpu.dot_dimension_numbers<[1], [0], [0], [1], [0, 0, 1, 1], [], []>} : vector<8x32xf32>, vector<32x128xf32>, vector<8x128xf32> -> vector<8x128xf32>
    %c0_13 = arith.constant 0 : index
    %c0_14 = arith.constant 0 : index
    %20 = vector.load %arg5[%c0_13, %c0_14] : memref<8x128xf32, #tpu.memory_space<vmem>>, vector<8x128xf32>
    tpu.vector_store %arg5[%c0_13, %c0_14], %19 {strides = array<i32>} : memref<8x128xf32, #tpu.memory_space<vmem>>, vector<8x128xf32>,
    %c0_15 = arith.constant 0 : index
    %c0_16 = arith.constant 0 : index
    %21 = vector.load %arg5[%c0_15, %c0_16] : memref<8x128xf32, #tpu.memory_space<vmem>>, vector<8x128xf32>
    %c0_17 = arith.constant 0 : index
    %c0_18 = arith.constant 0 : index
    %c0_19 = arith.constant 0 : index
    %22 = vector.load %arg3[%c0_17, %c0_18, %c0_19] : memref<1x8x128xf32, #tpu.memory_space<vmem>>, vector<1x8x128xf32>
    %23 = vector.shape_cast %22 : vector<1x8x128xf32> to vector<8x128xf32>
    %24 = vector.shape_cast %21 : vector<8x128xf32> to vector<1x8x128xf32>
    tpu.vector_store %arg3[%c0_17, %c0_18, %c0_19], %24 {strides = array<i32>} : memref<1x8x128xf32, #tpu.memory_space<vmem>>, vector<1x8x128xf32>,
    return
  }
  func.func @transform_0(%arg0: i32) -> (i32, i32, i32) {
    %c0_i32 = arith.constant 0 : i32
    %c0_i32_0 = arith.constant 0 : i32
    %c0_i32_1 = arith.constant 0 : i32
    return %arg0, %c0_i32, %c0_i32_0 : i32, i32, i32
  }
  func.func @transform_1(%arg0: i32) -> (i32, i32) {
    %c0_i32 = arith.constant 0 : i32
    %c0_i32_0 = arith.constant 0 : i32
    %c0_i32_1 = arith.constant 0 : i32
    return %c0_i32, %c0_i32_0 : i32, i32
  }
  func.func @transform_2(%arg0: i32) -> (i32, i32, i32) {
    %c0_i32 = arith.constant 0 : i32
    %c0_i32_0 = arith.constant 0 : i32
    %c0_i32_1 = arith.constant 0 : i32
    return %arg0, %c0_i32, %c0_i32_0 : i32, i32, i32
  }
}

</mosaic_0001>

<bundles_post_ra>
// kernel: tpu_custom_call.1
= control target key start
LH: loop header
LB: loop body
LE: loop exit
PB: predicated region body
PF: predicated region fallthrough
CT: control target
= control target key end

     0   :  { %7 = vsyncpa [#allocation5], 0  ;;  %s845_s0 = inlined_call_operand.hbm [shape: f32[2,8,256], index: 0, kind: input, shape index: {}]   ;;  %s846_s1 = inlined_call_operand.hbm [shape: f32[8,32], index: 1, kind: input, shape index: {}]   ;;  %s847_s2 = inlined_call_operand.hbm [shape: f32[2,8,128], index: 2, kind: output, shape index: {}]  }
   0x1   :  { %9 = vsyncpa [#allocation5 + $0x1], 0 }
   0x2   :  { %10 = vsyncpa [#allocation8], 0 }
   0x3   :  { %11 = vsyncpa [#allocation6], 0 }
   0x4   :  { %13 = vsyncpa [#allocation6 + $0x1], 0  ;;  %s643_s9 = smov 0   ;;  %s645_s10 = smov 0  }
   0x5   :  { %s647_s11 = smov 0   ;;  %s649_s12 = smov 0  }
   0x6 LB: > { %s664_s13 = sadd.s32 4294967295, %s616_s12   ;;  %s373_s14 = sadd.s32 4294967294, %s616_s12   ;;  %s616_s12 = sphi %s649_s12, %s871_s12   ;;  %s612_s11 = sphi %s647_s11, %s870_s11   ;;  %s608_s10 = sphi %s645_s10, %s869_s10   ;;  %s604_s9 = sphi %s643_s9, %s868_s9  }
   0x7   : > { %p39_p0 = scmp.ne.s32.totalorder %s608_s10, %s604_s9  ;;  %p848_p1 = scmp.eq.s32.totalorder %s664_s13, 0 }
   0x8   : > { %p90_p3 = scmp.eq.s32.totalorder %s373_s14, 1  ;;  %p374_p5 = scmp.ge.s32.totalorder %s616_s12, 1 }
   0x9   : > { %p673_p4 = por %p848_p1, %p39_p0  ;;  %p97_p7 = scmp.lt.s32.totalorder %s616_s12, 3 }
   0xa   : > { %p678_p6 = por %p90_p3, %p39_p0  ;;  %s618_s18 = smov [#allocation7]  }
   0xb   : > { %s851_s15 = scalar_select %p673_p4, 1, 0 }
   0xc   : > { %s852_s16 = scalar_select %p678_p6, 1, 0 }
   0xd   : > { %p683_p8 = pnand %p374_p5, %p97_p7  ;;  %s110_s19 = sshll.u32 %s618_s18, 4  ;;  %s111_s19 = int_to_ptr.vmem [resolvable:$true] %s110_s19 }
   0xe   : > { %s691_s20 = sadd.s32 1, %s616_s12   ;;  %s26_s24 = sadd.s32 1, %s612_s11 }
   0xf   : > { %s853_s17 = scalar_select %p683_p8, 1, 0 }
  0x10   : > { %p422_p10 = pneg %p683_p8  ;;  %s23_s22 = ssub.s32 %s616_s12, %s691_s20 }
  0x11   : > { %p701_p12 = scmp.eq.s32.totalorder %s23_s22, 0  ;;  %s488_s27 = scalar_lea.hbm %s846_s1, 128 }
  0x12   : > { %p695_p11 = pnand %p422_p10, %p848_p1  ;;  %p489_p0 = scmp.ne.s32.totalorder %s846_s1, %s488_s27 }
  0x13   : > { %s855_s23 = scalar_select %p701_p12, 1, 0 }
  0x14   : > { %p490_p3 = pneg %p695_p11  ;;  %p495_p10 = scmp.lt.u32.totalorder %s488_s27, %s846_s1 }
  0x16   : > { %p491_p5 = pnand %p490_p3, %p489_p0 }
  0x18   : > { %p492_p7 = pneg %p491_p5 }
  0x1a   : > { %p497_p9 = pnand %p495_p10, %p492_p7 }
  0x1c   : > { %500 = shalt.err (!%p497_p9)
}
  0x1d   : > { %s501_s4 = scalar_lea.vmem %s111_s19, 128  ;;  %p509_p6 = scmp.lt.s32.totalorder %s111_s19, %s111_s19 }
  0x1e   : > { %p502_p1 = scmp.ne.s32.totalorder %s111_s19, %s501_s4  ;;  %p510_p4 = scmp.lt.s32.totalorder %s501_s4, %s501_s4 }
  0x20   : > { %p504_p2 = pnand %p502_p1, %p490_p3  ;;  %p511_p8 = por %p510_p4, %p509_p6 }
  0x22   : > { %p505_p13 = pneg %p504_p2 }
  0x24   : > { %p512_p12 = pnand %p511_p8, %p505_p13 }
  0x26   : > { %515 = shalt.err (!%p512_p12)
}
  0x27   : > { %425 = dma.hbm_to_vmem [thread:$0]  (!%p695_p11), %s846_s1, 128, %s111_s19, [#allocation8]  }
  0x28   : > { %p856_p1 = scmp.ne.s32.totalorder %s855_s23, 0  ;;  %p34_p2 = scmp.eq.s32.totalorder %s616_s12, 0 }
  0x29   : > { %p857_p4 = scmp.ne.s32.totalorder %s612_s11, %s608_s10  ;;  %p858_p6 = scmp.eq.s32.totalorder %s664_s13, 1 }
  0x2a   : > { %s727_s7 = scalar_select %p856_p1, %s612_s11, %s26_s24  }
  0x2b   : > { %p735_p8 = por %p858_p6, %p857_p4  ;;  %p435_p9 = scmp.lt.s32.totalorder %s616_s12, 2 }
  0x2c   : > { %s121_s14 = sand.u32 1, %s612_s11   ;;  %p860_p12 = pmov %p857_p4 }
  0x2d   : > { %s377_s18 = sshll.u32 %s121_s14, 4  ;;  %s389_s21 = sshll.u32 %s616_s12, 8 }
  0x2e   : > { %p35_p13 = por %p34_p2, %p860_p12  ;;  %s748_s19 = scalar_lea.hbm %s845_s0, %s389_s21 }
  0x2f   : > { %s125_s23 = scalar_lea.vmem [#allocation4], %s377_s18  ;;  %s122_s27 = scalar_lea.sflag [#allocation5], %s121_s14 }
  0x30   : > { %s133_s24 = sshll.u32 %s125_s23, 4  ;;  %p750_p11 = pnand %p435_p9, %p35_p13  ;;  %s754_s24 = int_to_ptr.vmem [resolvable:$true] %s133_s24 }
  0x31   : > { %s516_s28 = scalar_lea.hbm %s748_s19, 256  ;;  %s521_s3 = scalar_lea.hbm %s845_s0, 512 }
  0x32   : > { %p517_p0 = scmp.ne.s32.totalorder %s748_s19, %s516_s28  ;;  %p518_p3 = pneg %p750_p11 }
  0x33   : > { %p522_p10 = scmp.lt.u32.totalorder %s748_s19, %s845_s0  ;;  %p523_p1 = scmp.lt.u32.totalorder %s521_s3, %s516_s28 }
  0x34   : > { %p519_p5 = pnand %p518_p3, %p517_p0  ;;  %p525_p4 = scmp.lt.u32.totalorder %s516_s28, %s748_s19 }
  0x35   : > { %p524_p2 = por %p523_p1, %p522_p10 }
  0x36   : > { %p520_p7 = pneg %p519_p5 }
  0x37   : > { %p526_p6 = por %p525_p4, %p524_p2 }
  0x39   : > { %p527_p9 = pnand %p526_p6, %p520_p7 }
  0x3b   : > { %530 = shalt.err (!%p527_p9)
}
  0x3c   : > { %s531_s6 = scalar_lea.vmem %s754_s24, 256  ;;  %s619_s14 = smov [#allocation4]  }
  0x3d   : > { %p532_p12 = scmp.ne.s32.totalorder %s754_s24, %s531_s6  ;;  %s536_s18 = sshll.u32 %s619_s14, 4  ;;  %s537_s18 = int_to_ptr.vmem [resolvable:$false] %s536_s18 }
  0x3e   : > { %s538_s21 = scalar_lea.vmem %s537_s18, 512  ;;  %p539_p5 = scmp.lt.s32.totalorder %s754_s24, %s537_s18 }
  0x3f   : > { %p534_p13 = pnand %p532_p12, %p518_p3  ;;  %p540_p10 = scmp.lt.s32.totalorder %s538_s21, %s531_s6 }
  0x41   : > { %p535_p0 = pneg %p534_p13  ;;  %p541_p1 = por %p540_p10, %p539_p5 }
  0x43   : > { %p542_p2 = pnand %p541_p1, %p535_p0 }
  0x45   : > { %545 = shalt.err (!%p542_p2)
}
  0x46   : > { %429 = dma.hbm_to_vmem [thread:$0]  (!%p750_p11), %s748_s19, 256, %s754_s24, %s122_s27  }
  0x47   : > { %p862_p7 = scmp.ne.s32.totalorder %s853_s17, 0 }
  0x48   : > { %s784_s22 = sand.u32 (!%p862_p7), 1, %s608_s10   ;;  %p863_p3 = scmp.ne.s32.totalorder (!%p862_p7), %s851_s15, 0 }
  0x49   : > { %142 = sbr.rel (%p862_p7) target bundleno = 440 (0x1b8), region = 28  ;;  %s381_s25 = sshll.u32 (!%p862_p7), %s784_s22, 4 }
  0x4a   : > { %s145_s23 = scalar_lea.sflag (!%p862_p7), [#allocation5], %s784_s22  ;;  %s148_s28 = scalar_lea.vmem (!%p862_p7), [#allocation4], %s381_s25 }
  0x50   : > { %591 = dma.done.wait (%p863_p3), %s145_s23, 256  }
  0x51   : > { %593 = vsyncadd (%p863_p3), %s145_s23, 4294967040  ;;  %p864_p4 = scmp.eq.s32.totalorder %s664_s13, 0 }
  0x53   : > { %595 = dma.done.wait (%p864_p4), [#allocation8], 128   ;;  %p865_p11 = pmov %p864_p4 }
  0x54   : > { %v620_v0 = vmov 0.0|0.0   ;;  %v178_v1 = vld [vmem:[%s148_s28] sm:$0xff]  ;;  %v179_v2 = vld [vmem:[%s148_s28 + $0x8] sm:$0xff]  ;;  %vm621_vm0 = vmmov 0   ;;  %v622_v3 = vmov 0.0   ;;  %s623_s17 = smov 127   ;;  %v173_v5 = vlaneseq }
  0x55   : > { %597 = vsyncadd (%p865_p11), [#allocation8], 4294967168  ;;  %407 = vmatprep.subr.bf16.mxu0 %v620_v0  ;;  %404 = vmatprep.mubr.msk.f32.mxu0 %vm621_vm0, %v622_v3  ;;  %v478_v4 = vpack.i.bf16 %v179_v2, %v178_v1  ;;  %s624_s19 = smov 126   ;;  %vm625_vm4 = vmmov 1   ;;  %v626_v17 = vmov 1.0   ;;  %v197_v19 = vld [vmem:[#allocation7] sm:$0xff] }
  0x56   : > { %v186_v6 = vand.u32 127, %v173_v5  ;;  %v174_v8 = vshrl.u32 %v173_v5, 7  ;;  %vm202_vm6 = vcmask 261120   ;;  %s383_s15 = sshll.u32 %s784_s22, 3  ;;  %s386_s27 = sshll.u32 %s664_s13, 7 }
  0x57   : > { %479 = vrot.lane.b32.xlu0 %v478_v4, %s623_s17  ;;  %s172_s24 = scalar_lea.vmem [#allocation9], %s383_s15  ;;  %s803_s3 = scalar_lea.hbm %s847_s2, %s386_s27 }
  0x58   : > { %vm187_vm1 = vcmp.lt.s32.totalorder %v186_v6, 127  ;;  %vm194_vm2 = vcmp.lt.s32.totalorder %v186_v6, 126  ;;  %vm175_vm3 = vcmp.eq.s32.totalorder %v174_v8, 0  ;;  %s293_s26 = sshll.u32 %s172_s24, 4  ;;  %s280_s4 = scalar_lea.sflag [#allocation6], %s784_s22  ;;  %s798_s26 = int_to_ptr.vmem [resolvable:$true] %s293_s26 }
  0x59   : > { %vm412_vm5 = vmpackc.low %vm175_vm3, %vm625_vm4  ;;  %s546_s5 = scalar_lea.vmem %s798_s26, 128  ;;  %s627_s13 = smov [#allocation9]  }
  0x5a   : > { %p547_p6 = scmp.ne.s32.totalorder %s798_s26, %s546_s5  ;;  %s550_s6 = sshll.u32 %s627_s13, 4  ;;  %s551_s6 = int_to_ptr.vmem [resolvable:$false] %s550_s6 }
  0x5b   : > { %484 = vrot.lane.b32.xlu0 %v478_v4, %s624_s19  ;;  %s552_s14 = scalar_lea.vmem %s551_s6, 256  ;;  %p553_p13 = scmp.lt.s32.totalorder %s798_s26, %s551_s6 }
  0x5c   : > { %p548_p9 = pnand %p547_p6, %p735_p8  ;;  %p554_p0 = scmp.lt.s32.totalorder %s552_s14, %s546_s5 }
  0x5e   : > { %p549_p12 = pneg %p548_p9  ;;  %p555_p5 = por %p554_p0, %p553_p13 }
  0x60   : > { %p556_p10 = pnand %p555_p5, %p549_p12 }
  0xc9   : > { %v480_v7 = vpop.permute.xlu0 %479 }
  0xca   : > { %v482_v9 = vunpack.i.h.bf16 %v480_v7  ;;  %v481_v10 = vunpack.i.l.bf16 %v480_v7 }
  0xcc   : > { %v188_v11 = vsel %vm187_vm1, %v481_v10, %v482_v9 }
  0xcd   : > { %v485_v12 = vpop.permute.xlu0 %484  ;;  %v408_v13 = vpack.c.bf16 %v188_v11, %v178_v1 }
  0xce   : > { %v487_v14 = vunpack.i.h.bf16 %v485_v12  ;;  %v486_v15 = vunpack.i.l.bf16 %v485_v12 }
  0xcf   : > { %409 = vmatpush3.bf16.msra.mxu0 %v408_v13 }
  0xd0   : > { %v195_v16 = vsel %vm194_vm2, %v486_v15, %v487_v14  ;;  %410 = vmatprep.subr.bf16.mxu0 %v620_v0 }
  0xd1   : > { %v411_v18 = vpack.c.bf16 %v626_v17, %v195_v16 }
  0xd3   : > { %413 = vmatpush3.bf16.msk.msra.mxu0 %vm412_vm5, %v411_v18 }
  0xd6   : > { %405 = vmatmul.mubr.msk.f32.vlgmr.msra.gmra.mrb[0].mxu0 %vm202_vm6, %v197_v19 }
 0x1a9   : > { %v272_v20 = vpop.f32.mrb[0].mxu0 }
 0x1aa   : > { %278 = vst [vmem:[%s172_s24] sm:$0xff] %v272_v20  ;;  %v406_v21 = vpop.f32.mrb[1].mxu0 }
 0x1ab   : > { %559 = shalt.err (!%p556_p10)
}
 0x1ac   : > { %s560_s18 = scalar_lea.hbm %s803_s3, 128  ;;  %s564_s25 = scalar_lea.hbm %s847_s2, 256 }
 0x1ad   : > { %p561_p1 = scmp.ne.s32.totalorder %s803_s3, %s560_s18  ;;  %p565_p3 = scmp.lt.u32.totalorder %s803_s3, %s847_s2 }
 0x1ae   : > { %p566_p4 = scmp.lt.u32.totalorder %s564_s25, %s560_s18  ;;  %p568_p6 = scmp.lt.u32.totalorder %s560_s18, %s803_s3 }
 0x1af   : > { %p562_p2 = pnand %p561_p1, %p735_p8 }
 0x1b0   : > { %p567_p11 = por %p566_p4, %p565_p3 }
 0x1b1   : > { %p563_p7 = pneg %p562_p2 }
 0x1b2   : > { %p569_p9 = por %p568_p6, %p567_p11 }
 0x1b4   : > { %p570_p12 = pnand %p569_p9, %p563_p7 }
 0x1b6   : > { %573 = shalt.err (!%p570_p12)
}
 0x1b7   : > { %420 = dma.vmem_to_hbm [thread:$0]  (%p735_p8), %s798_s26, 128, %s803_s3, %s280_s4  }
 0x1b8 PF: > { %s305_s17 = sand.u32 1, %s604_s9   ;;  %p866_p13 = scmp.ne.s32.totalorder %s852_s16, 0 }
 0x1b9   : > { %p867_p0 = scmp.ge.s32.totalorder %s616_s12, 2  ;;  %s306_s19 = scalar_lea.sflag [#allocation6], %s305_s17 }
 0x1bb   : > { %p431_p5 = pnand %p867_p0, %p866_p13 }
 0x1bd   : > { %599 = dma.done.wait (!%p431_p5), %s306_s19, 128  }
 0x1be   : > { %601 = vsyncadd (!%p431_p5), %s306_s19, 4294967168  ;;  %p16_p10 = scmp.ge.s32.totalorder %s691_s20, 4   ;;  %s868_s9 = smov %s608_s10 }
 0x1bf   : > { %s869_s10 = smov %s612_s11  ;;  %s870_s11 = smov %s727_s7 }
 0x1c0   : > { %s871_s12 = smov %s691_s20  ;;  %18 = sbr.rel (!%p16_p10) target bundleno = 6 (0x6), region = 77 }
 0x1c7   :  { %311 = vsyncpa [#allocation5], 1 }
 0x1c8   :  { %313 = vsyncpa [#allocation5 + $0x1], 1 }
 0x1c9   :  { %314 = vsyncpa [#allocation8], 1 }
 0x1ca   :  { %315 = vsyncpa [#allocation6], 1 }
 0x1cb   :  { %317 = vsyncpa [#allocation6 + $0x1], 1 }

// kernel: tpu_custom_call.1
= control target key start
LH: loop header
LB: loop body
LE: loop exit
PB: predicated region body
PF: predicated region fallthrough
CT: control target
= control target key end

     0   :  { %7 = vsyncpa [#allocation5], 0  ;;  %s845_s0 = inlined_call_operand.hbm [shape: f32[2,8,256], index: 0, kind: input, shape index: {}]   ;;  %s846_s1 = inlined_call_operand.hbm [shape: f32[8,32], index: 1, kind: input, shape index: {}]   ;;  %s847_s2 = inlined_call_operand.hbm [shape: f32[2,8,128], index: 2, kind: output, shape index: {}]  }
   0x1   :  { %9 = vsyncpa [#allocation5 + $0x1], 0 }
   0x2   :  { %10 = vsyncpa [#allocation8], 0 }
   0x3   :  { %11 = vsyncpa [#allocation6], 0 }
   0x4   :  { %13 = vsyncpa [#allocation6 + $0x1], 0  ;;  %s643_s9 = smov 0   ;;  %s645_s10 = smov 0  }
   0x5   :  { %s647_s11 = smov 0   ;;  %s649_s12 = smov 0  }
   0x6 LB: > { %s664_s13 = sadd.s32 4294967295, %s616_s12   ;;  %s373_s14 = sadd.s32 4294967294, %s616_s12   ;;  %s616_s12 = sphi %s649_s12, %s871_s12   ;;  %s612_s11 = sphi %s647_s11, %s870_s11   ;;  %s608_s10 = sphi %s645_s10, %s869_s10   ;;  %s604_s9 = sphi %s643_s9, %s868_s9  }
   0x7   : > { %p39_p0 = scmp.ne.s32.totalorder %s608_s10, %s604_s9  ;;  %p848_p1 = scmp.eq.s32.totalorder %s664_s13, 0 }
   0x8   : > { %p90_p3 = scmp.eq.s32.totalorder %s373_s14, 1  ;;  %p374_p5 = scmp.ge.s32.totalorder %s616_s12, 1 }
   0x9   : > { %p673_p4 = por %p848_p1, %p39_p0  ;;  %p97_p7 = scmp.lt.s32.totalorder %s616_s12, 3 }
   0xa   : > { %p678_p6 = por %p90_p3, %p39_p0  ;;  %s618_s18 = smov [#allocation7]  }
   0xb   : > { %s851_s15 = scalar_select %p673_p4, 1, 0 }
   0xc   : > { %s852_s16 = scalar_select %p678_p6, 1, 0 }
   0xd   : > { %p683_p8 = pnand %p374_p5, %p97_p7  ;;  %s110_s19 = sshll.u32 %s618_s18, 4  ;;  %s111_s19 = int_to_ptr.vmem [resolvable:$true] %s110_s19 }
   0xe   : > { %s691_s20 = sadd.s32 1, %s616_s12   ;;  %s26_s24 = sadd.s32 1, %s612_s11 }
   0xf   : > { %s853_s17 = scalar_select %p683_p8, 1, 0 }
  0x10   : > { %p422_p10 = pneg %p683_p8  ;;  %s23_s22 = ssub.s32 %s616_s12, %s691_s20 }
  0x11   : > { %p701_p12 = scmp.eq.s32.totalorder %s23_s22, 0  ;;  %s488_s27 = scalar_lea.hbm %s846_s1, 128 }
  0x12   : > { %p695_p11 = pnand %p422_p10, %p848_p1  ;;  %p489_p0 = scmp.ne.s32.totalorder %s846_s1, %s488_s27 }
  0x13   : > { %s855_s23 = scalar_select %p701_p12, 1, 0 }
  0x14   : > { %p490_p3 = pneg %p695_p11  ;;  %p495_p10 = scmp.lt.u32.totalorder %s488_s27, %s846_s1 }
  0x16   : > { %p491_p5 = pnand %p490_p3, %p489_p0 }
  0x18   : > { %p492_p7 = pneg %p491_p5 }
  0x1a   : > { %p497_p9 = pnand %p495_p10, %p492_p7 }
  0x1c   : > { %500 = shalt.err (!%p497_p9)
}
  0x1d   : > { %s501_s4 = scalar_lea.vmem %s111_s19, 128  ;;  %p509_p6 = scmp.lt.s32.totalorder %s111_s19, %s111_s19 }
  0x1e   : > { %p502_p1 = scmp.ne.s32.totalorder %s111_s19, %s501_s4  ;;  %p510_p4 = scmp.lt.s32.totalorder %s501_s4, %s501_s4 }
  0x20   : > { %p504_p2 = pnand %p502_p1, %p490_p3  ;;  %p511_p8 = por %p510_p4, %p509_p6 }
  0x22   : > { %p505_p13 = pneg %p504_p2 }
  0x24   : > { %p512_p12 = pnand %p511_p8, %p505_p13 }
  0x26   : > { %515 = shalt.err (!%p512_p12)
}
  0x27   : > { %425 = dma.hbm_to_vmem [thread:$0]  (!%p695_p11), %s846_s1, 128, %s111_s19, [#allocation8]  }
  0x28   : > { %p856_p1 = scmp.ne.s32.totalorder %s855_s23, 0  ;;  %p34_p2 = scmp.eq.s32.totalorder %s616_s12, 0 }
  0x29   : > { %p857_p4 = scmp.ne.s32.totalorder %s612_s11, %s608_s10  ;;  %p858_p6 = scmp.eq.s32.totalorder %s664_s13, 1 }
  0x2a   : > { %s727_s7 = scalar_select %p856_p1, %s612_s11, %s26_s24  }
  0x2b   : > { %p735_p8 = por %p858_p6, %p857_p4  ;;  %p435_p9 = scmp.lt.s32.totalorder %s616_s12, 2 }
  0x2c   : > { %s121_s14 = sand.u32 1, %s612_s11   ;;  %p860_p12 = pmov %p857_p4 }
  0x2d   : > { %s377_s18 = sshll.u32 %s121_s14, 4  ;;  %s389_s21 = sshll.u32 %s616_s12, 8 }
  0x2e   : > { %p35_p13 = por %p34_p2, %p860_p12  ;;  %s748_s19 = scalar_lea.hbm %s845_s0, %s389_s21 }
  0x2f   : > { %s125_s23 = scalar_lea.vmem [#allocation4], %s377_s18  ;;  %s122_s27 = scalar_lea.sflag [#allocation5], %s121_s14 }
  0x30   : > { %s133_s24 = sshll.u32 %s125_s23, 4  ;;  %p750_p11 = pnand %p435_p9, %p35_p13  ;;  %s754_s24 = int_to_ptr.vmem [resolvable:$true] %s133_s24 }
  0x31   : > { %s516_s28 = scalar_lea.hbm %s748_s19, 256  ;;  %s521_s3 = scalar_lea.hbm %s845_s0, 512 }
  0x32   : > { %p517_p0 = scmp.ne.s32.totalorder %s748_s19, %s516_s28  ;;  %p518_p3 = pneg %p750_p11 }
  0x33   : > { %p522_p10 = scmp.lt.u32.totalorder %s748_s19, %s845_s0  ;;  %p523_p1 = scmp.lt.u32.totalorder %s521_s3, %s516_s28 }
  0x34   : > { %p519_p5 = pnand %p518_p3, %p517_p0  ;;  %p525_p4 = scmp.lt.u32.totalorder %s516_s28, %s748_s19 }
  0x35   : > { %p524_p2 = por %p523_p1, %p522_p10 }
  0x36   : > { %p520_p7 = pneg %p519_p5 }
  0x37   : > { %p526_p6 = por %p525_p4, %p524_p2 }
  0x39   : > { %p527_p9 = pnand %p526_p6, %p520_p7 }
  0x3b   : > { %530 = shalt.err (!%p527_p9)
}
  0x3c   : > { %s531_s6 = scalar_lea.vmem %s754_s24, 256  ;;  %s619_s14 = smov [#allocation4]  }
  0x3d   : > { %p532_p12 = scmp.ne.s32.totalorder %s754_s24, %s531_s6  ;;  %s536_s18 = sshll.u32 %s619_s14, 4  ;;  %s537_s18 = int_to_ptr.vmem [resolvable:$false] %s536_s18 }
  0x3e   : > { %s538_s21 = scalar_lea.vmem %s537_s18, 512  ;;  %p539_p5 = scmp.lt.s32.totalorder %s754_s24, %s537_s18 }
  0x3f   : > { %p534_p13 = pnand %p532_p12, %p518_p3  ;;  %p540_p10 = scmp.lt.s32.totalorder %s538_s21, %s531_s6 }
  0x41   : > { %p535_p0 = pneg %p534_p13  ;;  %p541_p1 = por %p540_p10, %p539_p5 }
  0x43   : > { %p542_p2 = pnand %p541_p1, %p535_p0 }
  0x45   : > { %545 = shalt.err (!%p542_p2)
}
  0x46   : > { %429 = dma.hbm_to_vmem [thread:$0]  (!%p750_p11), %s748_s19, 256, %s754_s24, %s122_s27  }
  0x47   : > { %p862_p7 = scmp.ne.s32.totalorder %s853_s17, 0 }
  0x48   : > { %s784_s22 = sand.u32 (!%p862_p7), 1, %s608_s10   ;;  %p863_p3 = scmp.ne.s32.totalorder (!%p862_p7), %s851_s15, 0 }
  0x49   : > { %142 = sbr.rel (%p862_p7) target bundleno = 440 (0x1b8), region = 28  ;;  %s381_s25 = sshll.u32 (!%p862_p7), %s784_s22, 4 }
  0x4a   : > { %s145_s23 = scalar_lea.sflag (!%p862_p7), [#allocation5], %s784_s22  ;;  %s148_s28 = scalar_lea.vmem (!%p862_p7), [#allocation4], %s381_s25 }
  0x50   : > { %591 = dma.done.wait (%p863_p3), %s145_s23, 256  }
  0x51   : > { %593 = vsyncadd (%p863_p3), %s145_s23, 4294967040  ;;  %p864_p4 = scmp.eq.s32.totalorder %s664_s13, 0 }
  0x53   : > { %595 = dma.done.wait (%p864_p4), [#allocation8], 128   ;;  %p865_p11 = pmov %p864_p4 }
  0x54   : > { %v620_v0 = vmov 0.0|0.0   ;;  %v178_v1 = vld [vmem:[%s148_s28] sm:$0xff]  ;;  %v179_v2 = vld [vmem:[%s148_s28 + $0x8] sm:$0xff]  ;;  %vm621_vm0 = vmmov 0   ;;  %v622_v3 = vmov 0.0   ;;  %s623_s17 = smov 127   ;;  %v173_v5 = vlaneseq }
  0x55   : > { %597 = vsyncadd (%p865_p11), [#allocation8], 4294967168  ;;  %407 = vmatprep.subr.bf16.mxu0 %v620_v0  ;;  %404 = vmatprep.mubr.msk.f32.mxu0 %vm621_vm0, %v622_v3  ;;  %v478_v4 = vpack.i.bf16 %v179_v2, %v178_v1  ;;  %s624_s19 = smov 126   ;;  %vm625_vm4 = vmmov 1   ;;  %v626_v17 = vmov 1.0   ;;  %v197_v19 = vld [vmem:[#allocation7] sm:$0xff] }
  0x56   : > { %v186_v6 = vand.u32 127, %v173_v5  ;;  %v174_v8 = vshrl.u32 %v173_v5, 7  ;;  %vm202_vm6 = vcmask 261120   ;;  %s383_s15 = sshll.u32 %s784_s22, 3  ;;  %s386_s27 = sshll.u32 %s664_s13, 7 }
  0x57   : > { %479 = vrot.lane.b32.xlu0 %v478_v4, %s623_s17  ;;  %s172_s24 = scalar_lea.vmem [#allocation9], %s383_s15  ;;  %s803_s3 = scalar_lea.hbm %s847_s2, %s386_s27 }
  0x58   : > { %vm187_vm1 = vcmp.lt.s32.totalorder %v186_v6, 127  ;;  %vm194_vm2 = vcmp.lt.s32.totalorder %v186_v6, 126  ;;  %vm175_vm3 = vcmp.eq.s32.totalorder %v174_v8, 0  ;;  %s293_s26 = sshll.u32 %s172_s24, 4  ;;  %s280_s4 = scalar_lea.sflag [#allocation6], %s784_s22  ;;  %s798_s26 = int_to_ptr.vmem [resolvable:$true] %s293_s26 }
  0x59   : > { %vm412_vm5 = vmpackc.low %vm175_vm3, %vm625_vm4  ;;  %s546_s5 = scalar_lea.vmem %s798_s26, 128  ;;  %s627_s13 = smov [#allocation9]  }
  0x5a   : > { %p547_p6 = scmp.ne.s32.totalorder %s798_s26, %s546_s5  ;;  %s550_s6 = sshll.u32 %s627_s13, 4  ;;  %s551_s6 = int_to_ptr.vmem [resolvable:$false] %s550_s6 }
  0x5b   : > { %484 = vrot.lane.b32.xlu0 %v478_v4, %s624_s19  ;;  %s552_s14 = scalar_lea.vmem %s551_s6, 256  ;;  %p553_p13 = scmp.lt.s32.totalorder %s798_s26, %s551_s6 }
  0x5c   : > { %p548_p9 = pnand %p547_p6, %p735_p8  ;;  %p554_p0 = scmp.lt.s32.totalorder %s552_s14, %s546_s5 }
  0x5e   : > { %p549_p12 = pneg %p548_p9  ;;  %p555_p5 = por %p554_p0, %p553_p13 }
  0x60   : > { %p556_p10 = pnand %p555_p5, %p549_p12 }
  0xc9   : > { %v480_v7 = vpop.permute.xlu0 %479 }
  0xca   : > { %v482_v9 = vunpack.i.h.bf16 %v480_v7  ;;  %v481_v10 = vunpack.i.l.bf16 %v480_v7 }
  0xcc   : > { %v188_v11 = vsel %vm187_vm1, %v481_v10, %v482_v9 }
  0xcd   : > { %v485_v12 = vpop.permute.xlu0 %484  ;;  %v408_v13 = vpack.c.bf16 %v188_v11, %v178_v1 }
  0xce   : > { %v487_v14 = vunpack.i.h.bf16 %v485_v12  ;;  %v486_v15 = vunpack.i.l.bf16 %v485_v12 }
  0xcf   : > { %409 = vmatpush3.bf16.msra.mxu0 %v408_v13 }
  0xd0   : > { %v195_v16 = vsel %vm194_vm2, %v486_v15, %v487_v14  ;;  %410 = vmatprep.subr.bf16.mxu0 %v620_v0 }
  0xd1   : > { %v411_v18 = vpack.c.bf16 %v626_v17, %v195_v16 }
  0xd3   : > { %413 = vmatpush3.bf16.msk.msra.mxu0 %vm412_vm5, %v411_v18 }
  0xd6   : > { %405 = vmatmul.mubr.msk.f32.vlgmr.msra.gmra.mrb[0].mxu0 %vm202_vm6, %v197_v19 }
 0x1a9   : > { %v272_v20 = vpop.f32.mrb[0].mxu0 }
 0x1aa   : > { %278 = vst [vmem:[%s172_s24] sm:$0xff] %v272_v20  ;;  %v406_v21 = vpop.f32.mrb[1].mxu0 }
 0x1ab   : > { %559 = shalt.err (!%p556_p10)
}
 0x1ac   : > { %s560_s18 = scalar_lea.hbm %s803_s3, 128  ;;  %s564_s25 = scalar_lea.hbm %s847_s2, 256 }
 0x1ad   : > { %p561_p1 = scmp.ne.s32.totalorder %s803_s3, %s560_s18  ;;  %p565_p3 = scmp.lt.u32.totalorder %s803_s3, %s847_s2 }
 0x1ae   : > { %p566_p4 = scmp.lt.u32.totalorder %s564_s25, %s560_s18  ;;  %p568_p6 = scmp.lt.u32.totalorder %s560_s18, %s803_s3 }
 0x1af   : > { %p562_p2 = pnand %p561_p1, %p735_p8 }
 0x1b0   : > { %p567_p11 = por %p566_p4, %p565_p3 }
 0x1b1   : > { %p563_p7 = pneg %p562_p2 }
 0x1b2   : > { %p569_p9 = por %p568_p6, %p567_p11 }
 0x1b4   : > { %p570_p12 = pnand %p569_p9, %p563_p7 }
 0x1b6   : > { %573 = shalt.err (!%p570_p12)
}
 0x1b7   : > { %420 = dma.vmem_to_hbm [thread:$0]  (%p735_p8), %s798_s26, 128, %s803_s3, %s280_s4  }
 0x1b8 PF: > { %s305_s17 = sand.u32 1, %s604_s9   ;;  %p866_p13 = scmp.ne.s32.totalorder %s852_s16, 0 }
 0x1b9   : > { %p867_p0 = scmp.ge.s32.totalorder %s616_s12, 2  ;;  %s306_s19 = scalar_lea.sflag [#allocation6], %s305_s17 }
 0x1bb   : > { %p431_p5 = pnand %p867_p0, %p866_p13 }
 0x1bd   : > { %599 = dma.done.wait (!%p431_p5), %s306_s19, 128  }
 0x1be   : > { %601 = vsyncadd (!%p431_p5), %s306_s19, 4294967168  ;;  %p16_p10 = scmp.ge.s32.totalorder %s691_s20, 4   ;;  %s868_s9 = smov %s608_s10 }
 0x1bf   : > { %s869_s10 = smov %s612_s11  ;;  %s870_s11 = smov %s727_s7 }
 0x1c0   : > { %s871_s12 = smov %s691_s20  ;;  %18 = sbr.rel (!%p16_p10) target bundleno = 6 (0x6), region = 77 }
 0x1c7   :  { %311 = vsyncpa [#allocation5], 1 }
 0x1c8   :  { %313 = vsyncpa [#allocation5 + $0x1], 1 }
 0x1c9   :  { %314 = vsyncpa [#allocation8], 1 }
 0x1ca   :  { %315 = vsyncpa [#allocation6], 1 }
 0x1cb   :  { %317 = vsyncpa [#allocation6 + $0x1], 1 }

</bundles_post_ra>
